<compile_context>
chip_gen: v5e
topology: v5e:2x2
jax: 0.10.0
libtpu: 0.0.40
codegen_flags: <defaults>
</compile_context>

<pallas_src>
import functools

import jax
import jax.numpy as jnp
from jax.experimental import pallas as pl
from jax.experimental.pallas import tpu as pltpu

EPS = 1e-5


def _round_up(v, m):
    return (v + m - 1) // m * m


def mlp_kernel(x_ref, w1_ref, bn1_ref, w2_ref, bn2_ref, w3_ref, b3_ref,
               out_ref, acc_ref, *, d_in, tk):
    """Grid axis 0 iterates over K-tiles of the (huge) first matmul.

    The first matmul accumulates in a f32 VMEM scratch; on the last K step the
    tiny layers (BN1+ReLU, Linear2, BN2+ReLU, Linear3, Sigmoid) are fused in.
    """
    k = pl.program_id(0)

    @pl.when(k == 0)
    def _():
        acc_ref[...] = jnp.zeros_like(acc_ref)

    # ---- Layer-1 partial: (N, TK) @ (TK, H1), bf16 stream, f32 accumulate ----
    # The last K tile of x may extend past d_in; Pallas fills out-of-bounds
    # data with unspecified garbage, so mask those columns to exact zeros.
    # (w1 is pre-padded with real zero rows at init, so 0 * 0 contributes
    # nothing.)  For full tiles the mask is all-true (cheap VPU work hidden
    # under the w1 DMA stream).
    xv = x_ref[...]
    col = jax.lax.broadcasted_iota(jnp.int32, xv.shape, 1)
    valid = d_in - k * tk
    x_tile = jnp.where(col < valid, xv, jnp.zeros_like(xv))

    acc_ref[...] += jnp.dot(x_tile, w1_ref[...],
                            preferred_element_type=jnp.float32)

    @pl.when(k == pl.num_programs(0) - 1)
    def _():
        # ---- Linear1 bias + BatchNorm1d (batch stats) + ReLU (all f32) ----
        p1 = bn1_ref[...]                       # (3, H1): [bias, gamma, beta]
        b1, g1, be1 = p1[0:1, :], p1[1:2, :], p1[2:3, :]
        h = acc_ref[...] + b1
        mu = jnp.mean(h, axis=0, keepdims=True)
        var = jnp.mean((h - mu) ** 2, axis=0, keepdims=True)   # biased variance
        h = g1 * (h - mu) * jax.lax.rsqrt(var + EPS) + be1
        h = jnp.maximum(h, 0.0)

        # ---- Linear2 + BatchNorm1d + ReLU ----
        p2 = bn2_ref[...]                       # (3, H2): [bias, gamma, beta]
        b2, g2, be2 = p2[0:1, :], p2[1:2, :], p2[2:3, :]
        h2 = jnp.dot(h, w2_ref[...], preferred_element_type=jnp.float32) + b2
        mu2 = jnp.mean(h2, axis=0, keepdims=True)
        var2 = jnp.mean((h2 - mu2) ** 2, axis=0, keepdims=True)
        h2 = g2 * (h2 - mu2) * jax.lax.rsqrt(var2 + EPS) + be2
        h2 = jnp.maximum(h2, 0.0)

        # ---- Linear3 + Sigmoid ----
        logits = jnp.dot(h2, w3_ref[...],
                         preferred_element_type=jnp.float32) + b3_ref[...]
        out_ref[...] = jax.nn.sigmoid(logits)


def prepare_params(params, *, tk):
    """One-time (outside jit) preparation of the parameters.

    - Pads w1's K dim to a multiple of tk ONCE (no per-call jnp.pad of the big
      weight) and casts it to bf16 (the streamed operand that dominates HBM
      traffic).
    - Fuses (bias, gamma, beta) of each BatchNorm layer into a single (3, H)
      f32 block.  Everything in the tiny epilogue stays f32.
    """
    w1, b1, g1, be1, w2, b2, g2, be2, w3, b3 = params
    d_in = w1.shape[0]
    k_pad = pl.cdiv(d_in, tk) * tk
    w1_p = jnp.pad(w1, ((0, k_pad - d_in), (0, 0))).astype(jnp.bfloat16)
    bn1 = jnp.concatenate([b1, g1, be1], axis=0).astype(jnp.float32)   # (3, H1)
    bn2 = jnp.concatenate([b2, g2, be2], axis=0).astype(jnp.float32)   # (3, H2)
    return (w1_p, bn1, w2.astype(jnp.float32), bn2,
            w3.astype(jnp.float32), b3.astype(jnp.float32))


def _vmem_limit_bytes(n, tk, h1, h2, act_bytes=2):
    """Scoped-VMEM budget for the chosen tile config (double buffers + acc)."""
    n_p = _round_up(n, 8)
    h1p = _round_up(h1, 128)
    h2p = _round_up(h2, 128)
    est = (2 * tk * h1p * act_bytes        # w1 tile, double-buffered (bf16)
           + 2 * n_p * tk * act_bytes      # x tile, double-buffered (bf16)
           + n_p * h1p * 4                 # f32 accumulator scratch
           + 2 * 4 * (3 * h1p + 3 * h2p + h1p * h2p + h2p * 128 + 8 * 128)
           + n_p * 128 * 4)                # output block
    est = int(est * 3 // 2) + (4 << 20)    # headroom for internal scratch
    # Floor at the 32 MiB default scoped limit, cap at v7x's 64 MiB physical.
    return int(min(max(est, 32 << 20), 64 << 20))


@functools.partial(jax.jit, static_argnames=("tk",))
def new_model_forward(x, prepared, *, tk=2048):
    """x: (N, D_IN) float32.  Returns (N,) float32 == sigmoid(mlp(x))[:, 0].

    tk guidance: 1024-2048 (bf16) keeps the w1 stream at ~90%+ of HBM roofline
    on v5e/v6e/v7x while the double-buffered tiles stay well inside VMEM
    (v7x has only 64 MiB physical).
    """
    w1_p, bn1, w2, bn2, w3, b3 = prepared
    n, d_in = x.shape
    k_pad, h1 = w1_p.shape
    h2 = w2.shape[1]
    if k_pad % tk != 0 or k_pad != pl.cdiv(d_in, tk) * tk:
        raise ValueError("w1 must be pre-padded with prepare_params(..., tk=tk)")
    n_k = k_pad // tk

    # Only the big streamed operands go bf16; epilogue stays f32.
    x_bf = x.astype(jnp.bfloat16)

    kernel = functools.partial(mlp_kernel, d_in=d_in, tk=tk)

    grid_spec = pltpu.PrefetchScalarGridSpec(
        num_scalar_prefetch=0,
        grid=(n_k,),
        in_specs=[
            pl.BlockSpec((n, tk), lambda k: (0, k)),     # x tile  (bf16, ragged tail masked)
            pl.BlockSpec((tk, h1), lambda k: (k, 0)),    # w1 tile (bf16, pre-padded)
            pl.BlockSpec((3, h1), lambda k: (0, 0)),     # BN1 [bias, gamma, beta]
            pl.BlockSpec((h1, h2), lambda k: (0, 0)),    # w2
            pl.BlockSpec((3, h2), lambda k: (0, 0)),     # BN2 [bias, gamma, beta]
            pl.BlockSpec((h2, 1), lambda k: (0, 0)),     # w3
            pl.BlockSpec((1, 1), lambda k: (0, 0)),      # b3
        ],
        out_specs=pl.BlockSpec((n, 1), lambda k: (0, 0)),
        scratch_shapes=[pltpu.VMEM((n, h1), jnp.float32)],
    )

    out = pl.pallas_call(
        kernel,
        out_shape=jax.ShapeDtypeStruct((n, 1), jnp.float32),
        grid_spec=grid_spec,
        compiler_params=pltpu.CompilerParams(
            dimension_semantics=("arbitrary",),            # K is a reduction axis
            vmem_limit_bytes=_vmem_limit_bytes(n, tk, h1, h2),
        ),
    )(x_bf, w1_p, bn1, w2, bn2, w3, b3)

    return out[:, 0]


def reference_forward(x, prepared):
    """Pure-JAX reference with the same (bf16-stream, f32-accumulate) math."""
    w1_p, bn1, w2, bn2, w3, b3 = prepared
    d_in = x.shape[1]
    b1, g1, be1 = bn1[0:1], bn1[1:2], bn1[2:3]
    b2, g2, be2 = bn2[0:1], bn2[1:2], bn2[2:3]

    def bn(h, g, be):
        mu = jnp.mean(h, axis=0, keepdims=True)
        var = jnp.mean((h - mu) ** 2, axis=0, keepdims=True)
        return g * (h - mu) * jax.lax.rsqrt(var + EPS) + be

    h = jnp.dot(x.astype(jnp.bfloat16), w1_p[:d_in],
                preferred_element_type=jnp.float32) + b1
    h = jnp.maximum(bn(h, g1, be1), 0.0)
    h = jnp.dot(h, w2, preferred_element_type=jnp.float32) + b2
    h = jnp.maximum(bn(h, g2, be2), 0.0)
    h = jnp.dot(h, w3, preferred_element_type=jnp.float32) + b3
    return jax.nn.sigmoid(h)[:, 0]


def init_params(key, d_in, h1, h2):
    ks = jax.random.split(key, 6)
    w1 = jax.random.normal(ks[0], (d_in, h1), jnp.float32) * (1.0 / jnp.sqrt(d_in))
    b1 = jax.random.normal(ks[1], (1, h1), jnp.float32) * 0.01
    g1 = jnp.ones((1, h1), jnp.float32)
    be1 = jnp.zeros((1, h1), jnp.float32)
    w2 = jax.random.normal(ks[2], (h1, h2), jnp.float32) * (1.0 / jnp.sqrt(h1))
    b2 = jax.random.normal(ks[3], (1, h2), jnp.float32) * 0.01
    g2 = jnp.ones((1, h2), jnp.float32)
    be2 = jnp.zeros((1, h2), jnp.float32)
    w3 = jax.random.normal(ks[4], (h2, 1), jnp.float32) * (1.0 / jnp.sqrt(h2))
    b3 = jax.random.normal(ks[5], (1, 1), jnp.float32) * 0.01
    return (w1, b1, g1, be1, w2, b2, g2, be2, w3, b3)


if __name__ == "__main__":
    # Small stand-ins for the original 444417 -> 1000 -> 100 -> 1 MLP.
    # D_IN=417 is intentionally ragged to exercise the in-kernel K-tail mask;
    # TK=256 gives a 2-step K grid (at real scale the default tk=2048 is used).
    N, D_IN, H1, H2 = 8, 417, 256, 128
    TK = 256

    key = jax.random.PRNGKey(0)
    kx, kp = jax.random.split(key)
    x = jax.random.normal(kx, (N, D_IN), jnp.float32)
    params = init_params(kp, D_IN, H1, H2)
    prepared = prepare_params(params, tk=TK)       # one-time pad + bf16 cast

    out = new_model_forward(x, prepared, tk=TK)
    out = jax.block_until_ready(out)

    ref = reference_forward(x, prepared)
    assert out.shape == (N,)
    assert jnp.allclose(out, ref, atol=1e-3, rtol=1e-3), (out, ref)

    print("KERNEL_OK")
</pallas_src>

<mosaic_0001>
module attributes {stable_mosaic.version = 11 : i64} {
  func.func @mlp_kernel(%arg0: i32, %arg1: memref<8x256xbf16, #tpu.memory_space<vmem>>, %arg2: memref<256x256xbf16, #tpu.memory_space<vmem>>, %arg3: memref<3x256xf32, #tpu.memory_space<vmem>>, %arg4: memref<256x128xf32, #tpu.memory_space<vmem>>, %arg5: memref<3x128xf32, #tpu.memory_space<vmem>>, %arg6: memref<128x1xf32, #tpu.memory_space<vmem>>, %arg7: memref<1x1xf32, #tpu.memory_space<vmem>>, %arg8: memref<8x1xf32, #tpu.memory_space<vmem>>, %arg9: memref<8x256xf32, #tpu.memory_space<vmem>>) attributes {dimension_semantics = [#tpu.dimension_semantics<arbitrary>], iteration_bounds = array<i64: 2>, scalar_prefetch = 0 : i64, scratch_operands = 1 : i64, tpu.core_type = #tpu.core_type<tc>, window_params = [{transform_indices = @transform_0, window_bounds = array<i64: 8, 256>}, {transform_indices = @transform_1, window_bounds = array<i64: 256, 256>}, {pipeline_mode = #tpu.pipeline_mode<synchronous>, transform_indices = @transform_2, window_bounds = array<i64: 3, 256>}, {pipeline_mode = #tpu.pipeline_mode<synchronous>, transform_indices = @transform_3, window_bounds = array<i64: 256, 128>}, {pipeline_mode = #tpu.pipeline_mode<synchronous>, transform_indices = @transform_4, window_bounds = array<i64: 3, 128>}, {pipeline_mode = #tpu.pipeline_mode<synchronous>, transform_indices = @transform_5, window_bounds = array<i64: 128, 1>}, {pipeline_mode = #tpu.pipeline_mode<synchronous>, transform_indices = @transform_6, window_bounds = array<i64: 1, 1>}, {pipeline_mode = #tpu.pipeline_mode<synchronous>, transform_indices = @transform_7, window_bounds = array<i64: 8, 1>}]} {
    %c0_i32 = arith.constant 0 : i32
    %0 = arith.cmpi eq, %arg0, %c0_i32 : i32
    %1 = arith.extui %0 : i1 to i32
    %c0_i32_0 = arith.constant 0 : i32
    %2 = arith.cmpi ne, %1, %c0_i32_0 : i32
    scf.if %2 {
      %cst_10 = arith.constant 0.000000e+00 : f32
      %19 = vector.broadcast %cst_10 : f32 to vector<8x256xf32>
      %c0_11 = arith.constant 0 : index
      %c0_12 = arith.constant 0 : index
      %20 = vector.load %arg9[%c0_11, %c0_12] : memref<8x256xf32, #tpu.memory_space<vmem>>, vector<8x256xf32>
      tpu.vector_store %arg9[%c0_11, %c0_12], %19 {strides = array<i32>} : memref<8x256xf32, #tpu.memory_space<vmem>>, vector<8x256xf32>,
    } else {
    }
    %c0 = arith.constant 0 : index
    %c0_1 = arith.constant 0 : index
    %3 = vector.load %arg1[%c0, %c0_1] : memref<8x256xbf16, #tpu.memory_space<vmem>>, vector<8x256xbf16>
    %4 = tpu.iota {dimensions = array<i32: 1>} : vector<8x256xi32>
    %c256_i32 = arith.constant 256 : i32
    %5 = arith.muli %arg0, %c256_i32 : i32
    %c417_i32 = arith.constant 417 : i32
    %6 = arith.subi %c417_i32, %5 : i32
    %7 = vector.broadcast %6 : i32 to vector<8x256xi32>
    %8 = arith.cmpi slt, %4, %7 : vector<8x256xi32>
    %cst = arith.constant 0.000000e+00 : bf16
    %9 = vector.broadcast %cst : bf16 to vector<8x256xbf16>
    %10 = arith.select %8, %3, %9 : vector<8x256xi1>, vector<8x256xbf16>
    %c0_2 = arith.constant 0 : index
    %c0_3 = arith.constant 0 : index
    %11 = vector.load %arg9[%c0_2, %c0_3] : memref<8x256xf32, #tpu.memory_space<vmem>>, vector<8x256xf32>
    %c0_4 = arith.constant 0 : index
    %c0_5 = arith.constant 0 : index
    %12 = vector.load %arg2[%c0_4, %c0_5] : memref<256x256xbf16, #tpu.memory_space<vmem>>, vector<256x256xbf16>
    %cst_6 = arith.constant dense<0.000000e+00> : vector<8x256xf32>
    %13 = tpu.matmul %10, %12, %cst_6 {dimension_numbers = #tpu.dot_dimension_numbers<[1], [0], [0], [1], [0, 0, 1, 1], [], []>} : vector<8x256xbf16>, vector<256x256xbf16>, vector<8x256xf32> -> vector<8x256xf32>
    %14 = arith.addf %11, %13 : vector<8x256xf32>
    %c0_7 = arith.constant 0 : index
    %c0_8 = arith.constant 0 : index
    %15 = vector.load %arg9[%c0_7, %c0_8] : memref<8x256xf32, #tpu.memory_space<vmem>>, vector<8x256xf32>
    tpu.vector_store %arg9[%c0_7, %c0_8], %14 {strides = array<i32>} : memref<8x256xf32, #tpu.memory_space<vmem>>, vector<8x256xf32>,
    %c1_i32 = arith.constant 1 : i32
    %16 = arith.cmpi eq, %arg0, %c1_i32 : i32
    %17 = arith.extui %16 : i1 to i32
    %c0_i32_9 = arith.constant 0 : i32
    %18 = arith.cmpi ne, %17, %c0_i32_9 : i32
    scf.if %18 {
      %c0_10 = arith.constant 0 : index
      %c0_11 = arith.constant 0 : index
      %19 = vector.load %arg3[%c0_10, %c0_11] : memref<3x256xf32, #tpu.memory_space<vmem>>, vector<3x256xf32>
      %20 = vector.extract_strided_slice %19 {offsets = [0, 0], sizes = [1, 256], strides = [1, 1]} : vector<3x256xf32> to vector<1x256xf32>
      %21 = vector.extract_strided_slice %19 {offsets = [1, 0], sizes = [1, 256], strides = [1, 1]} : vector<3x256xf32> to vector<1x256xf32>
      %22 = vector.extract_strided_slice %19 {offsets = [2, 0], sizes = [1, 256], strides = [1, 1]} : vector<3x256xf32> to vector<1x256xf32>
      %c0_12 = arith.constant 0 : index
      %c0_13 = arith.constant 0 : index
      %23 = vector.load %arg9[%c0_12, %c0_13] : memref<8x256xf32, #tpu.memory_space<vmem>>, vector<8x256xf32>
      %24 = vector.broadcast %20 : vector<1x256xf32> to vector<8x256xf32>
      %25 = arith.addf %23, %24 : vector<8x256xf32>
      %cst_14 = arith.constant dense<0.000000e+00> : vector<256xf32>
      %26 = vector.multi_reduction <add>, %25, %cst_14 [0] : vector<8x256xf32> to vector<256xf32>
      %27 = vector.shape_cast %26 : vector<256xf32> to vector<1x256xf32>
      %cst_15 = arith.constant 8.000000e+00 : f32
      %28 = vector.broadcast %cst_15 : f32 to vector<1x256xf32>
      %29 = arith.divf %27, %28 : vector<1x256xf32>
      %30 = vector.broadcast %29 : vector<1x256xf32> to vector<8x256xf32>
      %31 = arith.subf %25, %30 : vector<8x256xf32>
      %32 = arith.mulf %31, %31 : vector<8x256xf32>
      %cst_16 = arith.constant dense<0.000000e+00> : vector<256xf32>
      %33 = vector.multi_reduction <add>, %32, %cst_16 [0] : vector<8x256xf32> to vector<256xf32>
      %34 = vector.shape_cast %33 : vector<256xf32> to vector<1x256xf32>
      %cst_17 = arith.constant 8.000000e+00 : f32
      %35 = vector.broadcast %cst_17 : f32 to vector<1x256xf32>
      %36 = arith.divf %34, %35 : vector<1x256xf32>
      %37 = vector.broadcast %29 : vector<1x256xf32> to vector<8x256xf32>
      %38 = arith.subf %25, %37 : vector<8x256xf32>
      %39 = vector.broadcast %21 : vector<1x256xf32> to vector<8x256xf32>
      %40 = arith.mulf %39, %38 : vector<8x256xf32>
      %cst_18 = arith.constant 9.99999974E-6 : f32
      %41 = vector.broadcast %cst_18 : f32 to vector<1x256xf32>
      %42 = arith.addf %36, %41 : vector<1x256xf32>
      %43 = math.rsqrt %42 : vector<1x256xf32>
      %44 = vector.broadcast %43 : vector<1x256xf32> to vector<8x256xf32>
      %45 = arith.mulf %40, %44 : vector<8x256xf32>
      %46 = vector.broadcast %22 : vector<1x256xf32> to vector<8x256xf32>
      %47 = arith.addf %45, %46 : vector<8x256xf32>
      %cst_19 = arith.constant 0.000000e+00 : f32
      %48 = vector.broadcast %cst_19 : f32 to vector<8x256xf32>
      %49 = arith.maximumf %47, %48 : vector<8x256xf32>
      %c0_20 = arith.constant 0 : index
      %c0_21 = arith.constant 0 : index
      %50 = vector.load %arg5[%c0_20, %c0_21] : memref<3x128xf32, #tpu.memory_space<vmem>>, vector<3x128xf32>
      %51 = vector.extract_strided_slice %50 {offsets = [0, 0], sizes = [1, 128], strides = [1, 1]} : vector<3x128xf32> to vector<1x128xf32>
      %52 = vector.extract_strided_slice %50 {offsets = [1, 0], sizes = [1, 128], strides = [1, 1]} : vector<3x128xf32> to vector<1x128xf32>
      %53 = vector.extract_strided_slice %50 {offsets = [2, 0], sizes = [1, 128], strides = [1, 1]} : vector<3x128xf32> to vector<1x128xf32>
      %c0_22 = arith.constant 0 : index
      %c0_23 = arith.constant 0 : index
      %54 = vector.load %arg4[%c0_22, %c0_23] : memref<256x128xf32, #tpu.memory_space<vmem>>, vector<256x128xf32>
      %cst_24 = arith.constant dense<0.000000e+00> : vector<8x128xf32>
      %55 = tpu.matmul %49, %54, %cst_24 {dimension_numbers = #tpu.dot_dimension_numbers<[1], [0], [0], [1], [0, 0, 1, 1], [], []>} : vector<8x256xf32>, vector<256x128xf32>, vector<8x128xf32> -> vector<8x128xf32>
      %56 = vector.broadcast %51 : vector<1x128xf32> to vector<8x128xf32>
      %57 = arith.addf %55, %56 : vector<8x128xf32>
      %cst_25 = arith.constant dense<0.000000e+00> : vector<128xf32>
      %58 = vector.multi_reduction <add>, %57, %cst_25 [0] : vector<8x128xf32> to vector<128xf32>
      %59 = vector.shape_cast %58 : vector<128xf32> to vector<1x128xf32>
      %cst_26 = arith.constant 8.000000e+00 : f32
      %60 = vector.broadcast %cst_26 : f32 to vector<1x128xf32>
      %61 = arith.divf %59, %60 : vector<1x128xf32>
      %62 = vector.broadcast %61 : vector<1x128xf32> to vector<8x128xf32>
      %63 = arith.subf %57, %62 : vector<8x128xf32>
      %64 = arith.mulf %63, %63 : vector<8x128xf32>
      %cst_27 = arith.constant dense<0.000000e+00> : vector<128xf32>
      %65 = vector.multi_reduction <add>, %64, %cst_27 [0] : vector<8x128xf32> to vector<128xf32>
      %66 = vector.shape_cast %65 : vector<128xf32> to vector<1x128xf32>
      %cst_28 = arith.constant 8.000000e+00 : f32
      %67 = vector.broadcast %cst_28 : f32 to vector<1x128xf32>
      %68 = arith.divf %66, %67 : vector<1x128xf32>
      %69 = vector.broadcast %61 : vector<1x128xf32> to vector<8x128xf32>
      %70 = arith.subf %57, %69 : vector<8x128xf32>
      %71 = vector.broadcast %52 : vector<1x128xf32> to vector<8x128xf32>
      %72 = arith.mulf %71, %70 : vector<8x128xf32>
      %cst_29 = arith.constant 9.99999974E-6 : f32
      %73 = vector.broadcast %cst_29 : f32 to vector<1x128xf32>
      %74 = arith.addf %68, %73 : vector<1x128xf32>
      %75 = math.rsqrt %74 : vector<1x128xf32>
      %76 = vector.broadcast %75 : vector<1x128xf32> to vector<8x128xf32>
      %77 = arith.mulf %72, %76 : vector<8x128xf32>
      %78 = vector.broadcast %53 : vector<1x128xf32> to vector<8x128xf32>
      %79 = arith.addf %77, %78 : vector<8x128xf32>
      %cst_30 = arith.constant 0.000000e+00 : f32
      %80 = vector.broadcast %cst_30 : f32 to vector<8x128xf32>
      %81 = arith.maximumf %79, %80 : vector<8x128xf32>
      %c0_31 = arith.constant 0 : index
      %c0_32 = arith.constant 0 : index
      %82 = vector.load %arg6[%c0_31, %c0_32] : memref<128x1xf32, #tpu.memory_space<vmem>>, vector<128x1xf32>
      %cst_33 = arith.constant dense<0.000000e+00> : vector<8x1xf32>
      %83 = tpu.matmul %81, %82, %cst_33 {dimension_numbers = #tpu.dot_dimension_numbers<[1], [0], [0], [1], [0, 0, 1, 1], [], []>} : vector<8x128xf32>, vector<128x1xf32>, vector<8x1xf32> -> vector<8x1xf32>
      %c0_34 = arith.constant 0 : index
      %c0_35 = arith.constant 0 : index
      %84 = vector.load %arg7[%c0_34, %c0_35] : memref<1x1xf32, #tpu.memory_space<vmem>>, vector<1x1xf32>
      %85 = vector.broadcast %84 : vector<1x1xf32> to vector<8x1xf32>
      %86 = arith.addf %83, %85 : vector<8x1xf32>
      %87 = arith.negf %86 : vector<8x1xf32>
      %88 = math.exp %87 : vector<8x1xf32>
      %cst_36 = arith.constant 1.000000e+00 : f32
      %89 = vector.broadcast %cst_36 : f32 to vector<8x1xf32>
      %90 = arith.addf %89, %88 : vector<8x1xf32>
      %91 = arith.divf %89, %90 : vector<8x1xf32>
      %c0_37 = arith.constant 0 : index
      %c0_38 = arith.constant 0 : index
      %92 = vector.load %arg8[%c0_37, %c0_38] : memref<8x1xf32, #tpu.memory_space<vmem>>, vector<8x1xf32>
      tpu.vector_store %arg8[%c0_37, %c0_38], %91 {strides = array<i32>} : memref<8x1xf32, #tpu.memory_space<vmem>>, vector<8x1xf32>,
    } else {
    }
    return
  }
  func.func @transform_0(%arg0: i32) -> (i32, i32) {
    %c0_i32 = arith.constant 0 : i32
    %c0_i32_0 = arith.constant 0 : i32
    return %c0_i32, %arg0 : i32, i32
  }
  func.func @transform_1(%arg0: i32) -> (i32, i32) {
    %c0_i32 = arith.constant 0 : i32
    %c0_i32_0 = arith.constant 0 : i32
    return %arg0, %c0_i32 : i32, i32
  }
  func.func @transform_2(%arg0: i32) -> (i32, i32) {
    %c0_i32 = arith.constant 0 : i32
    %c0_i32_0 = arith.constant 0 : i32
    %c0_i32_1 = arith.constant 0 : i32
    return %c0_i32, %c0_i32_0 : i32, i32
  }
  func.func @transform_3(%arg0: i32) -> (i32, i32) {
    %c0_i32 = arith.constant 0 : i32
    %c0_i32_0 = arith.constant 0 : i32
    %c0_i32_1 = arith.constant 0 : i32
    return %c0_i32, %c0_i32_0 : i32, i32
  }
  func.func @transform_4(%arg0: i32) -> (i32, i32) {
    %c0_i32 = arith.constant 0 : i32
    %c0_i32_0 = arith.constant 0 : i32
    %c0_i32_1 = arith.constant 0 : i32
    return %c0_i32, %c0_i32_0 : i32, i32
  }
  func.func @transform_5(%arg0: i32) -> (i32, i32) {
    %c0_i32 = arith.constant 0 : i32
    %c0_i32_0 = arith.constant 0 : i32
    %c0_i32_1 = arith.constant 0 : i32
    return %c0_i32, %c0_i32_0 : i32, i32
  }
  func.func @transform_6(%arg0: i32) -> (i32, i32) {
    %c0_i32 = arith.constant 0 : i32
    %c0_i32_0 = arith.constant 0 : i32
    %c0_i32_1 = arith.constant 0 : i32
    return %c0_i32, %c0_i32_0 : i32, i32
  }
  func.func @transform_7(%arg0: i32) -> (i32, i32) {
    %c0_i32 = arith.constant 0 : i32
    %c0_i32_0 = arith.constant 0 : i32
    %c0_i32_1 = arith.constant 0 : i32
    return %c0_i32, %c0_i32_0 : i32, i32
  }
}

</mosaic_0001>

<bundles_post_ra>
// kernel: new_model_forward.1
= control target key start
LH: loop header
LB: loop body
LE: loop exit
PB: predicated region body
PF: predicated region fallthrough
CT: control target
= control target key end

     0   :  { %s1593_s0 = inlined_call_operand.vmem [shape: bf16[8,417], index: 0, kind: input, shape index: {}]   ;;  %s1594_s1 = inlined_call_operand.hbm [shape: bf16[512,256], index: 1, kind: input, shape index: {}]   ;;  %s1595_s2 = inlined_call_operand.vmem [shape: f32[3,256], index: 2, kind: input, shape index: {}]   ;;  %s1596_s3 = inlined_call_operand.hbm [shape: f32[256,128], index: 3, kind: input, shape index: {}]   ;;  %s1597_s4 = inlined_call_operand.vmem [shape: f32[3,128], index: 4, kind: input, shape index: {}]   ;;  %s1598_s5 = inlined_call_operand.vmem [shape: f32[128,1], index: 5, kind: input, shape index: {}]   ;;  %s1599_s6 = inlined_call_operand.<no memory space> [shape: f32[1,1], index: 6, kind: input, shape index: {}]   ;;  %s1600_s7 = inlined_call_operand.vmem [shape: f32[8,1], index: 7, kind: output, shape index: {}]  }
   0x1   :  { %v12_v0 = vstv %s1599_s6 }
   0x2   :  { %13 = vst [vmem:[#allocation3] sm:$0x1] %v12_v0 }
   0x3   :  { %14 = vsyncpa [#allocation5], 0 }
   0x4   :  { %16 = vsyncpa [#allocation5 + $0x1], 0 }
   0x5   :  { %17 = vsyncpa [#allocation7], 0  ;;  %s1326_s26 = smov 0   ;;  %s1328_s27 = smov 0  }
   0x6   :  { %s1330_s28 = smov 0   ;;  %s1332_s29 = smov 0  }
   0x7 LB: > { %s1345_s6 = sadd.s32 4294967295, %s1276_s29   ;;  %p69_p0 = scmp.ne.s32.totalorder %s1268_s27, %s1264_s26  ;;  %s1276_s29 = sphi %s1332_s29, %s1607_s29   ;;  %s1272_s28 = sphi %s1330_s28, %s1606_s28   ;;  %s1268_s27 = sphi %s1328_s27, %s1605_s27   ;;  %s1264_s26 = sphi %s1326_s26, %s1604_s26  }
   0x8   : > { %p70_p1 = scmp.eq.s32.totalorder %s1345_s6, 0  ;;  %p931_p2 = scmp.ge.s32.totalorder %s1276_s29, 1 }
   0x9   : > { %p206_p3 = scmp.lt.s32.totalorder %s1276_s29, 3  ;;  %p932_p4 = scmp.ne.s32.totalorder %s1345_s6, 0 }
   0xa   : > { %p1354_p5 = por %p70_p1, %p69_p0  ;;  %s220_s10 = sshll.u32 %s1596_s3, 4  ;;  %s221_s10 = int_to_ptr.hbm [resolvable:$true] %s220_s10 }
   0xb   : > { %p1361_p6 = pnand %p931_p2, %p206_p3  ;;  %s1278_s12 = smov [#allocation6]  }
   0xc   : > { %s222_s13 = sshll.u32 %s1278_s12, 4  ;;  %s1370_s14 = sadd.s32 1, %s1276_s29   ;;  %s223_s13 = int_to_ptr.vmem [resolvable:$true] %s222_s13 }
   0xd   : > { %p1117_p7 = pneg %p1361_p6  ;;  %s1279_s15 = smov 128  }
   0xe   : > { %s1280_s16 = smov 8   ;;  %s53_s17 = ssub.s32 %s1276_s29, %s1370_s14 }
   0xf   : > { %p1118_p8 = pnand %p1117_p7, %p70_p1  ;;  %s56_s18 = sadd.s32 1, %s1272_s28 }
  0x10   : > { %p54_p9 = scmp.eq.s32.totalorder %s53_s17, 0  ;;  %p63_p10 = scmp.ne.s32.totalorder %s1272_s28, %s1268_s27 }
  0x11   : > { %1120 = dma.hbm_to_vmem [thread:$0]  (!%p1118_p8), %s221_s10, 4096, %s223_s13, [#allocation7], %s1279_s15, %s1279_s15, %s1280_s16  }
  0x12   : > { %p64_p11 = scmp.eq.s32.totalorder %s1276_s29, 0  ;;  %p1126_p12 = scmp.lt.s32.totalorder %s1276_s29, 2 }
  0x13   : > { %s1383_s19 = scalar_select %p54_p9, %s1272_s28, %s56_s18  }
  0x14   : > { %p65_p13 = por %p64_p11, %p63_p10  ;;  %s254_s20 = sand.u32 1, %s1272_s28  }
  0x15   : > { %s934_s21 = sshll.u32 %s254_s20, 8  ;;  %s1078_s22 = sshll.u32 %s1276_s29, 8 }
  0x16   : > { %s264_s25 = scalar_lea.hbm %s1594_s1, %s1078_s22  ;;  %s258_s26 = scalar_lea.vmem [#allocation4], %s934_s21 }
  0x17   : > { %s267_s8 = sshll.u32 %s258_s26, 4  ;;  %s265_s9 = sshll.u32 %s264_s25, 4  ;;  %s268_s8 = int_to_ptr.vmem [resolvable:$true] %s267_s8  ;;  %s266_s9 = int_to_ptr.hbm [resolvable:$true] %s265_s9 }
  0x18   : > { %p1390_p0 = pnand %p1126_p12, %p65_p13  ;;  %s255_s12 = scalar_lea.sflag [#allocation5], %s254_s20 }
  0x19   : > { %s1208_s13 = sshra.s32 %s266_s9, 4  ;;  %s1215_s21 = scalar_lea.hbm %s1594_s1, 512  ;;  %s1209_s13 = int_to_ptr.hbm [resolvable:$true] %s1208_s13 }
  0x1a   : > { %s1210_s17 = scalar_lea.hbm %s1209_s13, 256  ;;  %p1212_p3 = pneg %p1390_p0 }
  0x1b   : > { %p1211_p2 = scmp.ne.s32.totalorder %s1209_s13, %s1210_s17  ;;  %p1216_p9 = scmp.lt.s32.totalorder %s1209_s13, %s1594_s1 }
  0x1c   : > { %p1217_p10 = scmp.lt.s32.totalorder %s1215_s21, %s1210_s17 }
  0x1d   : > { %p1213_p7 = pnand %p1212_p3, %p1211_p2 }
  0x1e   : > { %p1218_p11 = por %p1217_p10, %p1216_p9 }
  0x1f   : > { %p1214_p8 = pneg %p1213_p7 }
  0x21   : > { %p1219_p12 = pnand %p1218_p11, %p1214_p8 }
  0x23   : > { %1222 = shalt.err (!%p1219_p12)
}
  0x24   : > { %1124 = dma.hbm_to_vmem [thread:$0]  (!%p1390_p0), %s266_s9, 4096, %s268_s8, %s255_s12, %s1279_s15, %s1279_s15, %s1280_s16  }
  0x25   : > { %279 = sbr.rel (%p1361_p6) target bundleno = 652 (0x28c), region = 48  ;;  %s281_s20 = sand.u32 (!%p1361_p6), 1, %s1268_s27  }
  0x26   : > { %s939_s24 = sshll.u32 (!%p1361_p6), %s281_s20, 8  ;;  %s282_s25 = scalar_lea.sflag (!%p1361_p6), [#allocation5], %s281_s20 }
  0x27   : > { %s1410_s26 = scalar_lea.vmem (!%p1361_p6), [#allocation4], %s939_s24 }
  0x2a   : > { %1255 = dma.done.wait (%p1354_p5), %s282_s25, 4096  }
  0x2b   : > { %1257 = vsyncadd (%p1354_p5), %s282_s25, 4294963200 }
  0x2c   : > { %1259 = dma.done.wait (%p70_p1), [#allocation7], 4096  }
  0x2d   : > { %1261 = vsyncadd (%p70_p1), [#allocation7], 4294963200  ;;  %s941_s11 = sshll.u32 %s1345_s6, 1 }
  0x2e   : > { %p323_p6 = scmp.lt.s32.totalorder %s941_s11, 3  ;;  %333 = sbr.rel (%p932_p4) target bundleno = 54 (0x36), region = 60 }
  0x30   : > { %s1609_s11 = smov (!%p323_p6, %s941_s11), 3 }
  0x31   : > { %s942_s15 = sshll.u32 %s1609_s11, 2 }
  0x32   : > { %s1424_s9 = scalar_lea.vmem %s1593_s0, %s942_s15 }
  0x33   : > { %v1281_v1 = vmov 0.0  }
  0x34   : > { %334 = vst [vmem:[#allocation2] sm:$0xff] %v1281_v1 }
  0x35   : > { %335 = vst [vmem:[#allocation2 + $0x8] sm:$0xff] %v1281_v1 }
  0x36 PF: > { %v1003_v2 = vld [vmem:[%s1410_s26 + $0x70] sm:$0xf]  ;;  %v1094_v3 = vld [vmem:[%s1410_s26 + $0x74] sm:$0xf0]  ;;  %v1093_v7 = vld [vmem:[%s1410_s26 + $0x74] sm:$0xf] }
  0x37   : > { %v1067_v4 = vld [vmem:[%s1410_s26 + $0xf0] sm:$0xf]  ;;  %v1004_v5 = vor.u32 %v1094_v3, %v1003_v2  ;;  %v1110_v6 = vld [vmem:[%s1410_s26 + $0xf4] sm:$0xf0]  ;;  %v1005_v8 = vld [vmem:[%s1410_s26 + $0x78] sm:$0xf0] }
  0x38   : > { %v1068_v9 = vor.u32 %v1110_v6, %v1067_v4  ;;  %v1008_v10 = vor.u32 %v1093_v7, %v1005_v8  ;;  %v1109_v11 = vld [vmem:[%s1410_s26 + $0xf4] sm:$0xf]  ;;  %v1069_v12 = vld [vmem:[%s1410_s26 + $0xf8] sm:$0xf0]  ;;  %v995_v13 = vld [vmem:[%s1410_s26 + $0x60] sm:$0xf]  ;;  %v337_v4 = vlaneseq }
  0x39   : > { %548 = vmatpush.bf16.msra.mxu0 %v1004_v5  ;;  %v1072_v14 = vor.u32 %v1109_v11, %v1069_v12  ;;  %v1092_v15 = vld [vmem:[%s1410_s26 + $0x64] sm:$0xf0]  ;;  %v1059_v16 = vld [vmem:[%s1410_s26 + $0xe0] sm:$0xf]  ;;  %v1091_v20 = vld [vmem:[%s1410_s26 + $0x64] sm:$0xf] }
  0x3a   : > { %v1108_v17 = vld [vmem:[%s1410_s26 + $0xe4] sm:$0xf0]  ;;  %561 = vmatpush.bf16.msra.mxu1 %v1068_v9  ;;  %574 = vmatpush.bf16.msra.mxu2 %v1008_v10  ;;  %v996_v18 = vor.u32 %v1092_v15, %v995_v13  ;;  %v997_v21 = vld [vmem:[%s1410_s26 + $0x68] sm:$0xf0]  ;;  %v1107_v22 = vld [vmem:[%s1410_s26 + $0xe4] sm:$0xf] }
  0x3b   : > { %v1060_v19 = vor.u32 %v1108_v17, %v1059_v16  ;;  %587 = vmatpush.bf16.msra.mxu3 %v1072_v14  ;;  %v1000_v23 = vor.u32 %v1091_v20, %v997_v21  ;;  %v1061_v24 = vld [vmem:[%s1410_s26 + $0xe8] sm:$0xf0]  ;;  %v987_v25 = vld [vmem:[%s1410_s26 + $0x50] sm:$0xf]  ;;  %v1090_v26 = vld [vmem:[%s1410_s26 + $0x54] sm:$0xf0] }
  0x3c   : > { %v1064_v27 = vor.u32 %v1107_v22, %v1061_v24  ;;  %v1051_v28 = vld [vmem:[%s1410_s26 + $0xd0] sm:$0xf]  ;;  %v1106_v29 = vld [vmem:[%s1410_s26 + $0xd4] sm:$0xf0]  ;;  %v1089_v30 = vld [vmem:[%s1410_s26 + $0x54] sm:$0xf]  ;;  %v988_v31 = vor.u32 %v1090_v26, %v987_v25 }
  0x3d   : > { %549 = vmatpush.bf16.msra.mxu0 %v996_v18  ;;  %v989_v32 = vld [vmem:[%s1410_s26 + $0x58] sm:$0xf0]  ;;  %v1105_v33 = vld [vmem:[%s1410_s26 + $0xd4] sm:$0xf]  ;;  %v1052_v35 = vor.u32 %v1106_v29, %v1051_v28  ;;  %v979_v37 = vld [vmem:[%s1410_s26 + $0x40] sm:$0xf] }
  0x3e   : > { %v1053_v34 = vld [vmem:[%s1410_s26 + $0xd8] sm:$0xf0]  ;;  %562 = vmatpush.bf16.msra.mxu1 %v1060_v19  ;;  %575 = vmatpush.bf16.msra.mxu2 %v1000_v23  ;;  %v992_v36 = vor.u32 %v1089_v30, %v989_v32  ;;  %v1088_v38 = vld [vmem:[%s1410_s26 + $0x44] sm:$0xf0]  ;;  %v1043_v39 = vld [vmem:[%s1410_s26 + $0xc0] sm:$0xf] }
  0x3f   : > { %588 = vmatpush.bf16.msra.mxu3 %v1064_v27  ;;  %v1056_v40 = vor.u32 %v1105_v33, %v1053_v34  ;;  %v1104_v41 = vld [vmem:[%s1410_s26 + $0xc4] sm:$0xf0]  ;;  %v1087_v42 = vld [vmem:[%s1410_s26 + $0x44] sm:$0xf]  ;;  %v981_v43 = vld [vmem:[%s1410_s26 + $0x48] sm:$0xf0]  ;;  %v980_v46 = vor.u32 %v1088_v38, %v979_v37 }
  0x40   : > { %v1103_v44 = vld [vmem:[%s1410_s26 + $0xc4] sm:$0xf]  ;;  %v1045_v45 = vld [vmem:[%s1410_s26 + $0xc8] sm:$0xf0]  ;;  %v1044_v47 = vor.u32 %v1104_v41, %v1043_v39  ;;  %v984_v48 = vor.u32 %v1087_v42, %v981_v43  ;;  %v971_v49 = vld [vmem:[%s1410_s26 + $0x30] sm:$0xf] }
  0x41   : > { %550 = vmatpush.bf16.msra.mxu0 %v988_v31  ;;  %v1086_v50 = vld [vmem:[%s1410_s26 + $0x34] sm:$0xf0]  ;;  %v1035_v51 = vld [vmem:[%s1410_s26 + $0xb0] sm:$0xf]  ;;  %v1048_v52 = vor.u32 %v1103_v44, %v1045_v45  ;;  %v1085_v54 = vld [vmem:[%s1410_s26 + $0x34] sm:$0xf] }
  0x42   : > { %563 = vmatpush.bf16.msra.mxu1 %v1052_v35  ;;  %576 = vmatpush.bf16.msra.mxu2 %v992_v36  ;;  %v1102_v53 = vld [vmem:[%s1410_s26 + $0xb4] sm:$0xf0]  ;;  %v973_v55 = vld [vmem:[%s1410_s26 + $0x38] sm:$0xf0]  ;;  %v1101_v56 = vld [vmem:[%s1410_s26 + $0xb4] sm:$0xf]  ;;  %v972_v58 = vor.u32 %v1086_v50, %v971_v49 }
  0x43   : > { %589 = vmatpush.bf16.msra.mxu3 %v1056_v40  ;;  %v1037_v57 = vld [vmem:[%s1410_s26 + $0xb8] sm:$0xf0]  ;;  %v1036_v59 = vor.u32 %v1102_v53, %v1035_v51  ;;  %v976_v60 = vor.u32 %v1085_v54, %v973_v55  ;;  %v963_v61 = vld [vmem:[%s1410_s26 + $0x20] sm:$0xf]  ;;  %v1084_v62 = vld [vmem:[%s1410_s26 + $0x24] sm:$0xf0] }
  0x44   : > { %v1027_v63 = vld [vmem:[%s1410_s26 + $0xa0] sm:$0xf]  ;;  %v1040_v0 = vor.u32 %v1101_v56, %v1037_v57  ;;  %v1100_v1 = vld [vmem:[%s1410_s26 + $0xa4] sm:$0xf0]  ;;  %v1083_v2 = vld [vmem:[%s1410_s26 + $0x24] sm:$0xf]  ;;  %v964_v7 = vor.u32 %v1084_v62, %v963_v61 }
  0x45   : > { %551 = vmatpush.bf16.msra.mxu0 %v980_v46  ;;  %v965_v3 = vld [vmem:[%s1410_s26 + $0x28] sm:$0xf0]  ;;  %v1099_v5 = vld [vmem:[%s1410_s26 + $0xa4] sm:$0xf]  ;;  %v955_v8 = vld [vmem:[%s1410_s26 + $0x10] sm:$0xf]  ;;  %v1028_v9 = vor.u32 %v1100_v1, %v1027_v63 }
  0x46   : > { %564 = vmatpush.bf16.msra.mxu1 %v1044_v47  ;;  %577 = vmatpush.bf16.msra.mxu2 %v984_v48  ;;  %v1029_v6 = vld [vmem:[%s1410_s26 + $0xa8] sm:$0xf0]  ;;  %v968_v10 = vor.u32 %v1083_v2, %v965_v3  ;;  %v1082_v11 = vld [vmem:[%s1410_s26 + $0x14] sm:$0xf0]  ;;  %v1019_v12 = vld [vmem:[%s1410_s26 + $0x90] sm:$0xf] }
  0x47   : > { %590 = vmatpush.bf16.msra.mxu3 %v1048_v52  ;;  %v1098_v13 = vld [vmem:[%s1410_s26 + $0x94] sm:$0xf0]  ;;  %v1032_v14 = vor.u32 %v1099_v5, %v1029_v6  ;;  %v1081_v15 = vld [vmem:[%s1410_s26 + $0x14] sm:$0xf]  ;;  %v957_v16 = vld [vmem:[%s1410_s26 + $0x18] sm:$0xf0]  ;;  %v956_v20 = vor.u32 %v1082_v11, %v955_v8 }
  0x48   : > { %v338_v17 = vand.u32 127, %v337_v4  ;;  %s944_s30 = sshll.u32 %s1345_s6, 8  ;;  %v1097_v18 = vld [vmem:[%s1410_s26 + $0x94] sm:$0xf]  ;;  %v1021_v19 = vld [vmem:[%s1410_s26 + $0x98] sm:$0xf0]  ;;  %v1020_v24 = vor.u32 %v1098_v13, %v1019_v12  ;;  %v960_v25 = vor.u32 %v1081_v15, %v957_v16 }
  0x49   : > { %552 = vmatpush.bf16.msra.mxu0 %v972_v58  ;;  %s341_s10 = ssub.s32 417, %s944_s30  ;;  %v947_v21 = vld [vmem:[%s1410_s26] sm:$0xf]  ;;  %v1080_v26 = vld [vmem:[%s1410_s26 + $0x4] sm:$0xf0]  ;;  %v336_v28 = vld [vmem:[%s1424_s9] sm:$0xff]  ;;  %v1024_v29 = vor.u32 %v1097_v18, %v1021_v19 }
  0x4a   : > { %565 = vmatpush.bf16.msra.mxu1 %v1036_v59  ;;  %578 = vmatpush.bf16.msra.mxu2 %v976_v60  ;;  %v339_v22 = vadd.s32 128, %v338_v17  ;;  %v342_v23 = vstv %s341_s10  ;;  %v1011_v27 = vld [vmem:[%s1410_s26 + $0x80] sm:$0xf]  ;;  %v1096_v30 = vld [vmem:[%s1410_s26 + $0x84] sm:$0xf0]  ;;  %v948_v35 = vor.u32 %v1080_v26, %v947_v21  ;;  %v347_v45 = vld [vmem:[#allocation2] sm:$0xff] }
  0x4b   : > { %591 = vmatpush.bf16.msra.mxu3 %v1040_v0  ;;  %vm343_vm0 = vcmp.lt.s32.totalorder %v338_v17, %v342_v23  ;;  %v1079_v31 = vld [vmem:[%s1410_s26 + $0x4] sm:$0xf]  ;;  %v949_v32 = vld [vmem:[%s1410_s26 + $0x8] sm:$0xf0]  ;;  %v1012_v37 = vor.u32 %v1096_v30, %v1011_v27  ;;  %v348_v50 = vld [vmem:[#allocation2 + $0x8] sm:$0xff]  ;;  %p1073_p1 = scmp.ne.s32.totalorder %s1345_s6, 1 }
  0x4c   : > { %vm344_vm1 = vcmp.lt.s32.totalorder %v339_v22, %v342_v23  ;;  %v1095_v33 = vld [vmem:[%s1410_s26 + $0x84] sm:$0xf]  ;;  %v1013_v34 = vld [vmem:[%s1410_s26 + $0x88] sm:$0xf0]  ;;  %v952_v38 = vor.u32 %v1079_v31, %v949_v32 }
  0x4d   : > { %553 = vmatpush.bf16.msra.mxu0 %v964_v7  ;;  %vm345_vm2 = vmpackc.low %vm344_vm1, %vm343_vm0  ;;  %v1016_v41 = vor.u32 %v1095_v33, %v1013_v34 }
  0x4e   : > { %566 = vmatpush.bf16.msra.mxu1 %v1028_v9  ;;  %579 = vmatpush.bf16.msra.mxu2 %v968_v10  ;;  %v346_v36 = vsel %vm345_vm2, %v336_v28, 0 }
  0x4f   : > { %592 = vmatpush.bf16.msra.mxu3 %v1032_v14  ;;  %v382_v39 = vunpack.c.l.b16 %v346_v36  ;;  %v383_v40 = vunpack.c.h.b16 %v346_v36 }
  0x51   : > { %554 = vmatpush.bf16.msra.mxu0 %v956_v20  ;;  %v384_v42 = vpack.c.b16 %v382_v39, %v382_v39  ;;  %v385_v43 = vpack.c.b16 %v383_v40, %v383_v40 }
  0x52   : > { %567 = vmatpush.bf16.msra.mxu1 %v1020_v24  ;;  %580 = vmatpush.bf16.msra.mxu2 %v960_v25 }
  0x53   : > { %593 = vmatpush.bf16.msra.mxu3 %v1024_v29 }
  0x55   : > { %555 = vmatpush.bf16.msra.mxu0 %v948_v35 }
  0x56   : > { %568 = vmatpush.bf16.msra.mxu1 %v1012_v37  ;;  %581 = vmatpush.bf16.msra.mxu2 %v952_v38 }
  0x57   : > { %594 = vmatpush.bf16.msra.mxu3 %v1016_v41 }
  0x58   : > { %556 = vmatmul.bf16.vlgmr.msra.gmra.mxu0 %v384_v42 }
  0x59   : > { %569 = vmatmul.bf16.vlgmr.msra.gmra.mxu1 %v385_v43  ;;  %582 = vmatmul.bf16.vlgmr.msra.gmra.mxu2 %v384_v42 }
  0x5a   : > { %595 = vmatmul.bf16.vlgmr.msra.gmra.mxu3 %v385_v43 }
  0xd5   : > { %v557_v44 = vpop.f32.mrf.mxu0 }
  0xd6   : > { %v570_v46 = vpop.f32.mrf.mxu1 }
  0xd7   : > { %v571_v47 = vadd.f32 %v570_v46, %v557_v44 }
  0xd9   : > { %v600_v48 = vadd.f32 %v571_v47, %v347_v45 }
  0xdb   : > { %602 = vst [vmem:[#allocation2] sm:$0xff] %v600_v48 }
  0xdc   : > { %v583_v49 = vpop.f32.mrf.mxu2 }
  0xdd   : > { %v596_v51 = vpop.f32.mrf.mxu3  ;;  %v559_v52 = vpop.f32.mrf.mxu0 }
  0xde   : > { %v597_v53 = vadd.f32 %v596_v51, %v583_v49  ;;  %v572_v54 = vpop.f32.mrf.mxu1 }
  0xe0   : > { %v601_v55 = vadd.f32 %v597_v53, %v348_v50 }
  0xe1   : > { %607 = sbr.rel (%p1073_p1) target bundleno = 652 (0x28c), region = 64 }
  0xe2   : > { %603 = vst [vmem:[#allocation2 + $0x8] sm:$0xff] %v601_v55 }
  0xe4   : > { %v585_v56 = vpop.f32.mrf.mxu2 }
  0xe5   : > { %v598_v57 = vpop.f32.mrf.mxu3 }
  0xe6   : > { %v717_v58 = vld [vmem:[#allocation6 + $0x78] sm:$0xff]  ;;  %v716_v59 = vld [vmem:[#allocation6 + $0x70] sm:$0xff]  ;;  %v1282_v62 = vmov 8.0   ;;  %v715_v63 = vld [vmem:[#allocation6 + $0x68] sm:$0xff]  ;;  %vm867_vm0 = vcmask 7168  }
  0xe7   : > { %v733_v60 = vld [vmem:[#allocation6 + $0xf8] sm:$0xff]  ;;  %735 = vmatpush.msra.mxu0 %v717_v58  ;;  %v732_v61 = vld [vmem:[#allocation6 + $0xf0] sm:$0xff]  ;;  %1166 = vrcp.f32 %v1282_v62  ;;  %v731_v0 = vld [vmem:[#allocation6 + $0xe8] sm:$0xff] }
  0xe8   : > { %755 = vmatpush.msra.mxu1 %v733_v60  ;;  %v714_v1 = vld [vmem:[#allocation6 + $0x60] sm:$0xff]  ;;  %v713_v3 = vld [vmem:[#allocation6 + $0x58] sm:$0xff]  ;;  %v712_v6 = vld [vmem:[#allocation6 + $0x50] sm:$0xff] }
  0xe9   : > { %736 = vmatpush.msra.mxu0 %v716_v59  ;;  %v730_v2 = vld [vmem:[#allocation6 + $0xe0] sm:$0xff]  ;;  %v729_v4 = vld [vmem:[#allocation6 + $0xd8] sm:$0xff]  ;;  %v728_v7 = vld [vmem:[#allocation6 + $0xd0] sm:$0xff] }
  0xea   : > { %756 = vmatpush.msra.mxu1 %v732_v61  ;;  %v711_v8 = vld [vmem:[#allocation6 + $0x48] sm:$0xff]  ;;  %v710_v12 = vld [vmem:[#allocation6 + $0x40] sm:$0xff]  ;;  %v610_v17 = vld [vmem:[#allocation2 + $0x8] sm:$0xff] }
  0xeb   : > { %737 = vmatpush.msra.mxu0 %v715_v63  ;;  %v727_v9 = vld [vmem:[#allocation6 + $0xc8] sm:$0xff]  ;;  %v726_v15 = vld [vmem:[#allocation6 + $0xc0] sm:$0xff]  ;;  %v709_v20 = vld [vmem:[#allocation6 + $0x38] sm:$0xff] }
  0xec   : > { %757 = vmatpush.msra.mxu1 %v731_v0  ;;  %v1500_v10 = vld [vmem:[%s1595_s2] sm:$0x77]  ;;  %v725_v21 = vld [vmem:[#allocation6 + $0xb8] sm:$0xff]  ;;  %v706_v34 = vld [vmem:[#allocation6 + $0x20] sm:$0xff] }
  0xed   : > { %v1495_v5 = vpop.eup %1166  ;;  %738 = vmatpush.msra.mxu0 %v714_v1  ;;  %v612_v13 = vperm.slane %v1500_v10, 0  ;;  %v613_v14 = vperm.slane %v1500_v10, 4  ;;  %v609_v16 = vld [vmem:[#allocation2] sm:$0xff]  ;;  %v722_v35 = vld [vmem:[#allocation6 + $0xa0] sm:$0xff]  ;;  %v705_v38 = vld [vmem:[#allocation6 + $0x18] sm:$0xff] }
  0xee   : > { %758 = vmatpush.msra.mxu1 %v730_v2  ;;  %v633_v11 = vmul.f32 8.0, %v1495_v5  ;;  %v708_v25 = vld [vmem:[#allocation6 + $0x30] sm:$0xff]  ;;  %v707_v29 = vld [vmem:[#allocation6 + $0x28] sm:$0xff]  ;;  %v721_v39 = vld [vmem:[#allocation6 + $0x98] sm:$0xff]  ;;  %vm637_vm3 = vweird.f32 %v1495_v5 }
  0xef   : > { %739 = vmatpush.msra.mxu0 %v713_v3  ;;  %v616_v18 = vperm.slane %v612_v13, 0  ;;  %v617_v19 = vperm.slane %v613_v14, 0  ;;  %v724_v26 = vld [vmem:[#allocation6 + $0xb0] sm:$0xff]  ;;  %v723_v30 = vld [vmem:[#allocation6 + $0xa8] sm:$0xff]  ;;  %v702_v52 = vld [vmem:[#allocation6] sm:$0xff]  ;;  %v659_v14 = vperm.slane %v1500_v10, 1 }
  0xf0   : > { %759 = vmatpush.msra.mxu1 %v729_v4  ;;  %v634_v22 = vsub.f32 1.0, %v633_v11  ;;  %v704_v43 = vld [vmem:[#allocation6 + $0x10] sm:$0xff]  ;;  %v703_v47 = vld [vmem:[#allocation6 + $0x8] sm:$0xff]  ;;  %v718_v4 = vld [vmem:[#allocation6 + $0x80] sm:$0xff] }
  0xf1   : > { %740 = vmatpush.msra.mxu0 %v712_v6  ;;  %v618_v23 = vadd.f32 %v616_v18, %v609_v16  ;;  %v619_v24 = vadd.f32 %v617_v19, %v610_v17  ;;  %v720_v44 = vld [vmem:[#allocation6 + $0x90] sm:$0xff]  ;;  %v719_v48 = vld [vmem:[#allocation6 + $0x88] sm:$0xff]  ;;  %v660_v17 = vperm.slane %v1500_v10, 5 }
  0xf2   : > { %760 = vmatpush.msra.mxu1 %v728_v7  ;;  %v635_v31 = vmul.f32 %v1495_v5, %v634_v22 }
  0xf3   : > { %741 = vmatpush.msra.mxu0 %v711_v8  ;;  %v620_v27 = vrot.slane %v618_v23, 4  ;;  %v626_v28 = vrot.slane %v619_v24, 4 }
  0xf4   : > { %761 = vmatpush.msra.mxu1 %v727_v9  ;;  %v636_v40 = vadd.f32 %v1495_v5, %v635_v31 }
  0xf5   : > { %742 = vmatpush.msra.mxu0 %v710_v12  ;;  %v621_v32 = vadd.f32 %v620_v27, %v618_v23  ;;  %v627_v33 = vadd.f32 %v626_v28, %v619_v24  ;;  %v692_v27 = vperm.slane %v1500_v10, 6 }
  0xf6   : > { %762 = vmatpush.msra.mxu1 %v726_v15  ;;  %v1509_v49 = vsel %vm637_vm3, %v1495_v5, %v636_v40 }
  0xf7   : > { %743 = vmatpush.msra.mxu0 %v709_v20  ;;  %v622_v36 = vrot.slane %v621_v32, 2  ;;  %v628_v37 = vrot.slane %v627_v33, 2  ;;  %v663_v20 = vperm.slane %v659_v14, 1 }
  0xf8   : > { %763 = vmatpush.msra.mxu1 %v725_v21 }
  0xf9   : > { %744 = vmatpush.msra.mxu0 %v708_v25  ;;  %v623_v41 = vadd.f32 %v622_v36, %v621_v32  ;;  %v629_v42 = vadd.f32 %v628_v37, %v627_v33 }
  0xfa   : > { %764 = vmatpush.msra.mxu1 %v724_v26 }
  0xfb   : > { %745 = vmatpush.msra.mxu0 %v707_v29  ;;  %v624_v45 = vrot.slane %v623_v41, 1  ;;  %v630_v46 = vrot.slane %v629_v42, 1 }
  0xfc   : > { %765 = vmatpush.msra.mxu1 %v723_v30 }
  0xfd   : > { %746 = vmatpush.msra.mxu0 %v706_v34  ;;  %v625_v50 = vadd.f32 %v624_v45, %v623_v41  ;;  %v631_v51 = vadd.f32 %v630_v46, %v629_v42 }
  0xfe   : > { %766 = vmatpush.msra.mxu1 %v722_v35  ;;  %v696_v35 = vperm.slane %v692_v27, 2 }
  0xff   : > { %747 = vmatpush.msra.mxu0 %v705_v38  ;;  %v639_v53 = vmul.f32 %v1509_v49, %v625_v50  ;;  %v640_v54 = vmul.f32 %v1509_v49, %v631_v51  ;;  %v821_v50 = vld [vmem:[%s1598_s5 + $0x68] sm:$0xff] }
 0x100   : > { %767 = vmatpush.msra.mxu1 %v721_v39 }
 0x101   : > { %748 = vmatpush.msra.mxu0 %v704_v43  ;;  %v641_v55 = vsub.f32 %v618_v23, %v639_v53  ;;  %v642_v56 = vsub.f32 %v619_v24, %v640_v54  ;;  %v664_v23 = vperm.slane %v660_v17, 1  ;;  %v691_v24 = vperm.slane %v1500_v10, 2  ;;  %v1522_v10 = vld [vmem:[%s1597_s4] sm:$0x7]  ;;  %v819_v54 = vld [vmem:[%s1598_s5 + $0x58] sm:$0xff] }
 0x102   : > { %768 = vmatpush.msra.mxu1 %v720_v44  ;;  %v734_v43 = vperm.slane %v1522_v10, 0  ;;  %v823_v44 = vld [vmem:[%s1598_s5 + $0x78] sm:$0xff]  ;;  %v805_v27 = vperm.slane %v1522_v10, 2 }
 0x103   : > { %749 = vmatpush.msra.mxu0 %v703_v47  ;;  %v643_v57 = vmul.f32 %v641_v55, %v641_v55  ;;  %v644_v58 = vmul.f32 %v642_v56, %v642_v56  ;;  %v665_v28 = vmul.f32 %v663_v20, %v641_v55  ;;  %v666_v31 = vmul.f32 %v664_v23, %v642_v56  ;;  %v818_v56 = vld [vmem:[%s1598_s5 + $0x50] sm:$0xff] }
 0x104   : > { %769 = vmatpush.msra.mxu1 %v719_v48  ;;  %v695_v32 = vperm.slane %v691_v24, 2  ;;  %828 = vmatpush.msra.mxu2 %v823_v44  ;;  %v822_v48 = vld [vmem:[%s1598_s5 + $0x70] sm:$0xff]  ;;  %v791_v23 = vperm.slane %v1522_v10, 1 }
 0x105   : > { %750 = vmatpush.msra.mxu0 %v702_v52  ;;  %v645_v59 = vrot.slane %v643_v57, 4  ;;  %v651_v60 = vrot.slane %v644_v58, 4  ;;  %v820_v52 = vld [vmem:[%s1598_s5 + $0x60] sm:$0xff] }
 0x106   : > { %770 = vmatpush.msra.mxu1 %v718_v4  ;;  %829 = vmatpush.msra.mxu2 %v822_v48  ;;  %v812_v4 = vld [vmem:[%s1598_s5 + $0x20] sm:$0xff] }
 0x107   : > { %v646_v61 = vadd.f32 %v645_v59, %v643_v57  ;;  %v652_v62 = vadd.f32 %v651_v60, %v644_v58  ;;  %v817_v58 = vld [vmem:[%s1598_s5 + $0x48] sm:$0xff]  ;;  %v816_v60 = vld [vmem:[%s1598_s5 + $0x40] sm:$0xff] }
 0x108   : > { %830 = vmatpush.msra.mxu2 %v821_v50 }
 0x109   : > { %v647_v63 = vrot.slane %v646_v61, 2  ;;  %v653_v0 = vrot.slane %v652_v62, 2 }
 0x10a   : > { %831 = vmatpush.msra.mxu2 %v820_v52 }
 0x10b   : > { %v648_v1 = vadd.f32 %v647_v63, %v646_v61  ;;  %v654_v2 = vadd.f32 %v653_v0, %v652_v62  ;;  %v815_v62 = vld [vmem:[%s1598_s5 + $0x38] sm:$0xff]  ;;  %v814_v0 = vld [vmem:[%s1598_s5 + $0x30] sm:$0xff] }
 0x10c   : > { %832 = vmatpush.msra.mxu2 %v819_v54 }
 0x10d   : > { %v649_v3 = vrot.slane %v648_v1, 1  ;;  %v655_v5 = vrot.slane %v654_v2, 1 }
 0x10e   : > { %833 = vmatpush.msra.mxu2 %v818_v56 }
 0x10f   : > { %v650_v6 = vadd.f32 %v649_v3, %v648_v1  ;;  %v656_v7 = vadd.f32 %v655_v5, %v654_v2  ;;  %v813_v2 = vld [vmem:[%s1598_s5 + $0x28] sm:$0xff] }
 0x110   : > { %834 = vmatpush.msra.mxu2 %v817_v58 }
 0x111   : > { %v657_v8 = vmul.f32 %v650_v6, %v1509_v49  ;;  %v658_v9 = vmul.f32 %v656_v7, %v1509_v49  ;;  %v811_v6 = vld [vmem:[%s1598_s5 + $0x18] sm:$0xff] }
 0x112   : > { %835 = vmatpush.msra.mxu2 %v816_v60 }
 0x113   : > { %v667_v11 = vadd.f32 1e-05, %v657_v8  ;;  %v668_v12 = vadd.f32 1e-05, %v658_v9  ;;  %v810_v8 = vld [vmem:[%s1598_s5 + $0x10] sm:$0xff] }
 0x114   : > { %836 = vmatpush.msra.mxu2 %v815_v62 }
 0x115   : > { %1168 = vrsqrt.f32 %v667_v11  ;;  %vm675_vm4 = vweird.f32 %v667_v11  ;;  %vm685_vm6 = vweird.f32 %v668_v12 }
 0x116   : > { %1170 = vrsqrt.f32 %v668_v12  ;;  %837 = vmatpush.msra.mxu2 %v814_v0 }
 0x118   : > { %838 = vmatpush.msra.mxu2 %v813_v2 }
 0x11a   : > { %839 = vmatpush.msra.mxu2 %v812_v4 }
 0x11b   : > { %v1169_v13 = vpop.eup %1168 }
 0x11c   : > { %v1171_v15 = vpop.eup %1170  ;;  %v670_v16 = vmul.f32 %v1169_v13, %v667_v11  ;;  %vm676_vm5 = vweird.f32 %v1169_v13  ;;  %840 = vmatpush.msra.mxu2 %v811_v6  ;;  %v809_v11 = vld [vmem:[%s1598_s5 + $0x8] sm:$0xff] }
 0x11d   : > { %v680_v18 = vmul.f32 %v1171_v15, %v668_v12  ;;  %vm686_vm7 = vweird.f32 %v1171_v15  ;;  %vm677_vm8 = vmor %vm675_vm4, %vm676_vm5 }
 0x11e   : > { %v671_v19 = vmul.f32 %v1169_v13, %v670_v16  ;;  %vm687_vm9 = vmor %vm685_vm6, %vm686_vm7  ;;  %841 = vmatpush.msra.mxu2 %v810_v8 }
 0x11f   : > { %v681_v21 = vmul.f32 %v1171_v15, %v680_v18 }
 0x120   : > { %v672_v22 = vmul.f32 0.5, %v671_v19  ;;  %842 = vmatpush.msra.mxu2 %v809_v11 }
 0x121   : > { %v682_v25 = vmul.f32 0.5, %v681_v21 }
 0x122   : > { %v673_v26 = vsub.f32 1.5, %v672_v22 }
 0x123   : > { %v683_v29 = vsub.f32 1.5, %v682_v25 }
 0x124   : > { %v674_v30 = vmul.f32 %v1169_v13, %v673_v26 }
 0x125   : > { %v684_v33 = vmul.f32 %v1171_v15, %v683_v29 }
 0x126   : > { %v678_v34 = vsel %vm677_vm8, %v1169_v13, %v674_v30  ;;  %v808_v13 = vld [vmem:[%s1598_s5] sm:$0xff] }
 0x127   : > { %v689_v36 = vmul.f32 %v678_v34, %v665_v28  ;;  %v688_v37 = vsel %vm687_vm9, %v1171_v15, %v684_v33  ;;  %843 = vmatpush.msra.mxu2 %v808_v13 }
 0x128   : > { %v690_v38 = vmul.f32 %v688_v37, %v666_v31  ;;  %v1165_v31 = vld [vmem:[#allocation3] ss:$0 sm:$0xff] }
 0x129   : > { %v697_v39 = vadd.f32 %v695_v32, %v689_v36 }
 0x12a   : > { %v698_v40 = vadd.f32 %v696_v35, %v690_v38 }
 0x12b   : > { %v699_v41 = vmax.f32 %v697_v39, 0.0 }
 0x12c   : > { %v700_v42 = vmax.f32 %v698_v40, 0.0 }
 0x12d   : > { %751 = vmatmul.f32.vlgmr.msra.gmra.mxu0 %v699_v41 }
 0x12e   : > { %771 = vmatmul.f32.vlgmr.msra.gmra.mxu1 %v700_v42 }
 0x1aa   : > { %v752_v45 = vpop.f32.mrf.mxu0 }
 0x1ab   : > { %v753_v46 = vadd.f32 %v752_v45, %v734_v43  ;;  %v772_v47 = vpop.f32.mrf.mxu1 }
 0x1ad   : > { %v773_v51 = vadd.f32 %v772_v47, %v753_v46 }
 0x1af   : > { %v775_v53 = vrot.slane %v773_v51, 4 }
 0x1b1   : > { %v776_v55 = vadd.f32 %v775_v53, %v773_v51 }
 0x1b3   : > { %v777_v57 = vrot.slane %v776_v55, 2 }
 0x1b5   : > { %v778_v59 = vadd.f32 %v777_v57, %v776_v55 }
 0x1b7   : > { %v779_v61 = vrot.slane %v778_v59, 1 }
 0x1b9   : > { %v780_v63 = vadd.f32 %v779_v61, %v778_v59 }
 0x1bb   : > { %v781_v1 = vmul.f32 %v780_v63, %v1509_v49 }
 0x1bd   : > { %v782_v3 = vsub.f32 %v773_v51, %v781_v1 }
 0x1bf   : > { %v783_v5 = vmul.f32 %v782_v3, %v782_v3  ;;  %v792_v26 = vmul.f32 %v791_v23, %v782_v3 }
 0x1c1   : > { %v784_v7 = vrot.slane %v783_v5, 4 }
 0x1c3   : > { %v785_v9 = vadd.f32 %v784_v7, %v783_v5 }
 0x1c5   : > { %v786_v12 = vrot.slane %v785_v9, 2 }
 0x1c7   : > { %v787_v14 = vadd.f32 %v786_v12, %v785_v9 }
 0x1c9   : > { %v788_v15 = vrot.slane %v787_v14, 1 }
 0x1cb   : > { %v789_v16 = vadd.f32 %v788_v15, %v787_v14 }
 0x1cd   : > { %v790_v17 = vmul.f32 %v789_v16, %v1509_v49 }
 0x1cf   : > { %v793_v18 = vadd.f32 1e-05, %v790_v17 }
 0x1d1   : > { %1172 = vrsqrt.f32 %v793_v18  ;;  %vm800_vm11 = vweird.f32 %v793_v18 }
 0x1d7   : > { %v1173_v19 = vpop.eup %1172 }
 0x1d8   : > { %v795_v20 = vmul.f32 %v1173_v19, %v793_v18  ;;  %vm801_vm10 = vweird.f32 %v1173_v19 }
 0x1d9   : > { %vm802_vm12 = vmor %vm800_vm11, %vm801_vm10 }
 0x1da   : > { %v796_v21 = vmul.f32 %v1173_v19, %v795_v20 }
 0x1dc   : > { %v797_v22 = vmul.f32 0.5, %v796_v21 }
 0x1de   : > { %v798_v24 = vsub.f32 1.5, %v797_v22 }
 0x1e0   : > { %v799_v25 = vmul.f32 %v1173_v19, %v798_v24 }
 0x1e2   : > { %v803_v28 = vsel %vm802_vm12, %v1173_v19, %v799_v25 }
 0x1e3   : > { %v804_v29 = vmul.f32 %v803_v28, %v792_v26 }
 0x1e5   : > { %v806_v30 = vadd.f32 %v805_v27, %v804_v29 }
 0x1e7   : > { %v807_v49 = vmax.f32 %v806_v30, 0.0 }
 0x1e9   : > { %844 = vmatmul.f32.vlgmr.msra.gmra.mxu2 %v807_v49 }
 0x26c   : > { %v845_v32 = vpop.f32.mrf.mxu2 }
 0x26d   : > { %v846_v33 = vadd.f32 %v1165_v31, %v845_v32 }
 0x26f   : > { %v1074_v34 = vmul.f32 -1.442695, %v846_v33 }
 0x271   : > { %1174 = vpow2.f32 %v1074_v34 }
 0x277   : > { %v1175_v35 = vpop.eup %1174 }
 0x278   : > { %v851_v36 = vadd.f32 1.0, %v1175_v35 }
 0x27a   : > { %1176 = vrcp.f32 %v851_v36  ;;  %v863_v40 = vand.u32 2147483648, %v851_v36  ;;  %v861_v42 = vand.u32 2147483647, %v851_v36  ;;  %vm857_vm14 = vweird.f32 %v851_v36 }
 0x27c   : > { %v864_v43 = vor.u32 1.1754944e-38, %v863_v40  ;;  %vm862_vm1 = vcmp.eq.f32.partialorder %v861_v42, 8.507059e+37 }
 0x280   : > { %v1177_v37 = vpop.eup %1176 }
 0x281   : > { %v853_v38 = vmul.f32 %v1177_v37, %v851_v36  ;;  %vm858_vm13 = vweird.f32 %v1177_v37 }
 0x282   : > { %vm859_vm15 = vmor %vm857_vm14, %vm858_vm13 }
 0x283   : > { %v854_v39 = vsub.f32 1.0, %v853_v38 }
 0x285   : > { %v855_v41 = vmul.f32 %v1177_v37, %v854_v39 }
 0x287   : > { %v856_v10 = vadd.f32 %v1177_v37, %v855_v41 }
 0x289   : > { %v860_v44 = vsel %vm859_vm15, %v1177_v37, %v856_v10 }
 0x28a   : > { %v865_v45 = vsel %vm862_vm1, %v864_v43, %v860_v44 }
 0x28b   : > { %868 = vst.msk [vmem:[%s1600_s7] sm:$0xff] %vm867_vm0, %v865_v45 }
 0x28c PF: > { %p20_p4 = scmp.ge.s32.totalorder %s1370_s14, 4   ;;  %s1604_s26 = smov %s1268_s27 }
 0x28d   : > { %s1605_s27 = smov %s1272_s28  ;;  %s1606_s28 = smov %s1383_s19 }
 0x28e   : > { %s1607_s29 = smov %s1370_s14  ;;  %22 = sbr.rel (!%p20_p4) target bundleno = 7 (0x7), region = 99 }
 0x293   :  { %880 = vsyncpa [#allocation5], 1 }
 0x294   :  { %882 = vsyncpa [#allocation5 + $0x1], 1 }
 0x295   :  { %883 = vsyncpa [#allocation7], 1 }

</bundles_post_ra>
